<compile_context>
chip_gen: v7x
topology: tpu7x:2x2x1
jax: 0.10.0
libtpu: 0.0.40
codegen_flags: <defaults>
</compile_context>

<pallas_src>
import functools
import math

import jax
import jax.numpy as jnp
from jax.experimental import pallas as pl
from jax.experimental.pallas import tpu as pltpu


def _attention_kernel(*refs, scale, has_mask):
    """Ref views: q/k/v/out are (G, head_dim, N); mask is (G, head_dim, head_dim)."""
    if has_mask:
        q_ref, k_ref, v_ref, mask_ref, o_ref = refs
    else:
        q_ref, k_ref, v_ref, o_ref = refs
        mask_ref = None

    q = q_ref[...]          # keep input dtype (bf16 feeds the MXU directly)
    k = k_ref[...]
    v = v_ref[...]

    # scores = (Q @ K^T) / sqrt(head_dim): contract over N directly (no
    # in-kernel transpose/relayout of K), f32 accumulation on the MXU.
    scores = jnp.einsum("gdn,gen->gde", q, k,
                        preferred_element_type=jnp.float32) * scale

    if has_mask:
        # masked_fill(mask == 0, -inf), identical to the PyTorch module.
        scores = jnp.where(mask_ref[...] == 0, float("-inf"), scores)

    # Numerically-stable softmax over the last axis, kept in f32. The
    # denominator is only (G, head_dim, 1), so exact division costs nothing.
    m = jnp.max(scores, axis=-1, keepdims=True)
    e = jnp.exp(scores - m)
    s = jnp.sum(e, axis=-1, keepdims=True)
    w = (e / s).astype(v.dtype)     # back to input dtype for the second MXU pass

    # output = weights @ V -> (G, head_dim, N), f32 accumulation.
    out = jnp.einsum("gde,gen->gdn", w, v,
                     preferred_element_type=jnp.float32)
    o_ref[...] = out.astype(o_ref.dtype)


def _round_up(x, m):
    return ((x + m - 1) // m) * m


def _vmem_limit_bytes():
    """Generation-aware scoped VMEM limit: ~3/4 of physical VMEM, capped at 100 MiB.

    v5e/v6e (128 MiB) -> ~96 MiB; v7x (64 MiB per TC) -> ~48 MiB.
    Falls back to a conservative 48 MiB if the hardware query is unavailable.
    """
    cap = None
    try:
        info = pltpu.get_tpu_info()
        cap = getattr(info, "vmem_capacity_bytes", None)
    except Exception:
        cap = None
    if not cap:
        cap = 64 * 1024 * 1024
    return int(min(100 * 1024 * 1024, (cap * 3) // 4))


def _pick_heads_per_block(total_heads, head_dim, seq_len, itemsize,
                          budget_bytes, min_grid_steps=4):
    """Largest divisor G of total_heads such that:
      * the grid has >= min_grid_steps steps (pipeline overlap + both v7x TCs
        get work via the "parallel" head-group axis), and
      * the per-step VMEM footprint fits budget_bytes, counting double-buffered
        q/k/v/out blocks (with sublane/lane tile padding) plus the in-kernel
        f32 intermediates (scores, e, w, pre-cast out) and the optional mask.
    """
    # Sublane packing of input dtype: f32 -> 8, bf16 -> 16, int8/fp8 -> 32.
    sub = max(8, (8 * 4) // max(1, itemsize))
    hd_pad_in = _round_up(head_dim, sub)
    hd_pad_f32 = _round_up(head_dim, 8)
    hd_pad_lane = _round_up(head_dim, 128)
    n_pad = _round_up(seq_len, 128)

    io_blk = hd_pad_in * n_pad * itemsize      # one (head_dim, N) io block
    f32_sq = hd_pad_f32 * hd_pad_lane * 4      # one (head_dim, head_dim) f32
    f32_out = hd_pad_f32 * n_pad * 4           # (head_dim, N) f32 pre-cast out

    # 3 inputs + 1 output, double-buffered; scores/e/w + f32 out; mask blocks
    # (counted conservatively even when no mask is passed).
    per_head = 2 * 4 * io_blk + 3 * f32_sq + f32_out + 2 * f32_sq

    max_heads_vmem = max(1, budget_bytes // per_head)
    max_heads_grid = max(1, total_heads // min_grid_steps)
    g = max(1, min(total_heads, max_heads_vmem, max_heads_grid))
    while total_heads % g:
        g -= 1
    return g


def simple_attention(query, key, value, num_heads, mask=None):
    """Pallas equivalent of SimpleAttention.forward(query, key, value, mask)."""
    B, dim, N = query.shape
    assert dim % num_heads == 0
    head_dim = dim // num_heads
    scale = 1.0 / math.sqrt(head_dim)
    total_heads = B * num_heads

    # Same memory order as torch .view(B, H, head_dim, N), flattened over (B, H).
    qh = query.reshape(total_heads, head_dim, N)
    kh = key.reshape(total_heads, head_dim, N)
    vh = value.reshape(total_heads, head_dim, N)

    vmem_limit = _vmem_limit_bytes()
    # Leave ~25% of the scoped limit as headroom for Mosaic internal scratch.
    G = _pick_heads_per_block(total_heads, head_dim, N, query.dtype.itemsize,
                              budget_bytes=(vmem_limit * 3) // 4,
                              min_grid_steps=4)
    grid = (total_heads // G,)
    # TODO(synk): for very large N a single head's (head_dim, N) slab may not
    # fit VMEM; that needs an "arbitrary" N-tile grid axis accumulating scores
    # into a (G, head_dim, head_dim) f32 scratch (no online softmax needed).
    # TODO(synk): for tiny N (< 128) the output store is a masked partial-lane
    # vst; a lane-dense repack of (head_dim, N) into the lane axis would help,
    # but at those sizes the op is fixed-overhead bound anyway.

    qkv_spec = pl.BlockSpec((G, head_dim, N), lambda i: (i, 0, 0))

    in_specs = [qkv_spec, qkv_spec, qkv_spec]
    operands = [qh, kh, vh]
    has_mask = mask is not None
    if has_mask:
        # torch masked_fill: mask broadcasts against (B, H, head_dim, head_dim).
        mh = jnp.broadcast_to(mask, (B, num_heads, head_dim, head_dim))
        mh = mh.astype(jnp.float32).reshape(total_heads, head_dim, head_dim)
        in_specs.append(pl.BlockSpec((G, head_dim, head_dim), lambda i: (i, 0, 0)))
        operands.append(mh)

    out = pl.pallas_call(
        functools.partial(_attention_kernel, scale=scale, has_mask=has_mask),
        grid=grid,
        in_specs=in_specs,
        out_specs=qkv_spec,
        out_shape=jax.ShapeDtypeStruct((total_heads, head_dim, N), query.dtype),
        compiler_params=pltpu.CompilerParams(
            # Head-group axis is fully parallel: shards across v7x's 2 TCs and
            # gives the pipeline >= 4 steps to overlap DMA with compute.
            dimension_semantics=("parallel",),
            vmem_limit_bytes=vmem_limit),
    )(*operands)

    # .contiguous().view(B, -1, N)  (free reshape: memory order already matches)
    return out.reshape(B, dim, N)


def _reference(query, key, value, num_heads, mask=None):
    B, dim, N = query.shape
    head_dim = dim // num_heads
    q = query.reshape(B, num_heads, head_dim, N)
    k = key.reshape(B, num_heads, head_dim, N)
    v = value.reshape(B, num_heads, head_dim, N)
    scores = jnp.einsum("bhdn,bhen->bhde", q, k) / math.sqrt(head_dim)
    if mask is not None:
        scores = jnp.where(jnp.broadcast_to(mask, scores.shape) == 0,
                           float("-inf"), scores)
    w = jax.nn.softmax(scores, axis=-1)
    out = jnp.einsum("bhde,bhen->bhdn", w, v)
    return out.reshape(B, dim, N)


if __name__ == "__main__":
    # Small shapes consistent with the module: B=2, dim=32, num_heads=4, N=16.
    B, dim, N, num_heads = 2, 32, 16, 4
    head_dim = dim // num_heads
    k0, k1, k2, k3 = jax.random.split(jax.random.PRNGKey(0), 4)
    query = jax.random.uniform(k0, (B, dim, N), dtype=jnp.float32)
    key = jax.random.uniform(k1, (B, dim, N), dtype=jnp.float32)
    value = jax.random.uniform(k2, (B, dim, N), dtype=jnp.float32)

    # Mask-free path.
    out = jax.block_until_ready(simple_attention(query, key, value, num_heads))
    ref = _reference(query, key, value, num_heads)
    assert out.shape == (B, dim, N)
    # Tolerance covers possible MXU multi-pass f32 vs XLA default-precision
    # differences between kernel and reference matmuls.
    assert jnp.allclose(out, ref, atol=2e-3, rtol=2e-3)

    # Masked path (mask broadcastable to (B, H, head_dim, head_dim); keep at
    # least one unmasked entry per row so softmax stays finite, as in torch).
    mask = (jax.random.uniform(k3, (B, 1, head_dim, head_dim)) > 0.3
            ).astype(jnp.float32)
    mask = jnp.maximum(mask, jnp.eye(head_dim, dtype=jnp.float32)[None, None])
    out_m = jax.block_until_ready(
        simple_attention(query, key, value, num_heads, mask=mask))
    ref_m = _reference(query, key, value, num_heads, mask=mask)
    assert jnp.allclose(out_m, ref_m, atol=2e-3, rtol=2e-3)

    print("KERNEL_OK")
</pallas_src>

<mosaic_0001>
module attributes {stable_mosaic.version = 11 : i64} {
  func.func @_attention_kernel(%arg0: i32, %arg1: memref<2x8x16xf32, #tpu.memory_space<vmem>>, %arg2: memref<2x8x16xf32, #tpu.memory_space<vmem>>, %arg3: memref<2x8x16xf32, #tpu.memory_space<vmem>>, %arg4: memref<2x8x16xf32, #tpu.memory_space<vmem>>) attributes {dimension_semantics = [#tpu.dimension_semantics<parallel>], iteration_bounds = array<i64: 4>, scalar_prefetch = 0 : i64, scratch_operands = 0 : i64, tpu.core_type = #tpu.core_type<tc>, window_params = [{transform_indices = @transform_0, window_bounds = array<i64: 2, 8, 16>}, {transform_indices = @transform_1, window_bounds = array<i64: 2, 8, 16>}, {transform_indices = @transform_2, window_bounds = array<i64: 2, 8, 16>}, {transform_indices = @transform_3, window_bounds = array<i64: 2, 8, 16>}]} {
    %c0 = arith.constant 0 : index
    %c0_0 = arith.constant 0 : index
    %c0_1 = arith.constant 0 : index
    %0 = vector.load %arg1[%c0, %c0_0, %c0_1] : memref<2x8x16xf32, #tpu.memory_space<vmem>>, vector<2x8x16xf32>
    %c0_2 = arith.constant 0 : index
    %c0_3 = arith.constant 0 : index
    %c0_4 = arith.constant 0 : index
    %1 = vector.load %arg2[%c0_2, %c0_3, %c0_4] : memref<2x8x16xf32, #tpu.memory_space<vmem>>, vector<2x8x16xf32>
    %c0_5 = arith.constant 0 : index
    %c0_6 = arith.constant 0 : index
    %c0_7 = arith.constant 0 : index
    %2 = vector.load %arg3[%c0_5, %c0_6, %c0_7] : memref<2x8x16xf32, #tpu.memory_space<vmem>>, vector<2x8x16xf32>
    "tpu.trace_start"() <{level = 10 : i32, message = "gdn,gen->gde"}> : () -> ()
    %cst = arith.constant dense<0.000000e+00> : vector<2x8x8xf32>
    %3 = tpu.matmul %0, %1, %cst {dimension_numbers = #tpu.dot_dimension_numbers<[2], [2], [1], [1], [0, 0, 0, 1, 1, 1], [0], [0]>} : vector<2x8x16xf32>, vector<2x8x16xf32>, vector<2x8x8xf32> -> vector<2x8x8xf32>
    "tpu.trace_stop"() : () -> ()
    %cst_8 = arith.constant 0.353553385 : f32
    %4 = vector.broadcast %cst_8 : f32 to vector<2x8x8xf32>
    %5 = arith.mulf %3, %4 : vector<2x8x8xf32>
    %cst_9 = arith.constant dense<0xFF800000> : vector<2x8xf32>
    %6 = vector.multi_reduction <maximumf>, %5, %cst_9 [2] : vector<2x8x8xf32> to vector<2x8xf32>
    %7 = vector.shape_cast %6 : vector<2x8xf32> to vector<2x8x1xf32>
    %8 = vector.broadcast %7 : vector<2x8x1xf32> to vector<2x8x8xf32>
    %9 = arith.subf %5, %8 : vector<2x8x8xf32>
    %10 = math.exp %9 : vector<2x8x8xf32>
    %cst_10 = arith.constant dense<0.000000e+00> : vector<2x8xf32>
    %11 = vector.multi_reduction <add>, %10, %cst_10 [2] : vector<2x8x8xf32> to vector<2x8xf32>
    %12 = vector.shape_cast %11 : vector<2x8xf32> to vector<2x8x1xf32>
    %13 = vector.broadcast %12 : vector<2x8x1xf32> to vector<2x8x8xf32>
    %14 = arith.divf %10, %13 : vector<2x8x8xf32>
    "tpu.trace_start"() <{level = 10 : i32, message = "gde,gen->gdn"}> : () -> ()
    %cst_11 = arith.constant dense<0.000000e+00> : vector<2x8x16xf32>
    %15 = tpu.matmul %14, %2, %cst_11 {dimension_numbers = #tpu.dot_dimension_numbers<[2], [1], [1], [2], [0, 0, 0, 1, 1, 2], [0], [0]>} : vector<2x8x8xf32>, vector<2x8x16xf32>, vector<2x8x16xf32> -> vector<2x8x16xf32>
    "tpu.trace_stop"() : () -> ()
    %c0_12 = arith.constant 0 : index
    %c0_13 = arith.constant 0 : index
    %c0_14 = arith.constant 0 : index
    %16 = vector.load %arg4[%c0_12, %c0_13, %c0_14] : memref<2x8x16xf32, #tpu.memory_space<vmem>>, vector<2x8x16xf32>
    tpu.vector_store %arg4[%c0_12, %c0_13, %c0_14], %15 {strides = array<i32>} : memref<2x8x16xf32, #tpu.memory_space<vmem>>, vector<2x8x16xf32>,
    return
  }
  func.func @transform_0(%arg0: i32) -> (i32, i32, i32) {
    %c0_i32 = arith.constant 0 : i32
    %c0_i32_0 = arith.constant 0 : i32
    %c0_i32_1 = arith.constant 0 : i32
    return %arg0, %c0_i32, %c0_i32_0 : i32, i32, i32
  }
  func.func @transform_1(%arg0: i32) -> (i32, i32, i32) {
    %c0_i32 = arith.constant 0 : i32
    %c0_i32_0 = arith.constant 0 : i32
    %c0_i32_1 = arith.constant 0 : i32
    return %arg0, %c0_i32, %c0_i32_0 : i32, i32, i32
  }
  func.func @transform_2(%arg0: i32) -> (i32, i32, i32) {
    %c0_i32 = arith.constant 0 : i32
    %c0_i32_0 = arith.constant 0 : i32
    %c0_i32_1 = arith.constant 0 : i32
    return %arg0, %c0_i32, %c0_i32_0 : i32, i32, i32
  }
  func.func @transform_3(%arg0: i32) -> (i32, i32, i32) {
    %c0_i32 = arith.constant 0 : i32
    %c0_i32_0 = arith.constant 0 : i32
    %c0_i32_1 = arith.constant 0 : i32
    return %arg0, %c0_i32, %c0_i32_0 : i32, i32, i32
  }
}

</mosaic_0001>

<bundles_post_ra>
// kernel: tpu_custom_call.1
= control target key start
LH: loop header
LB: loop body
LE: loop exit
PB: predicated region body
PF: predicated region fallthrough
CT: control target
= control target key end

     0   :  { %s1329_s0 = inlined_call_operand.hbm [shape: f32[8,8,16], index: 0, kind: input, shape index: {}]   ;;  %s1330_s1 = inlined_call_operand.hbm [shape: f32[8,8,16], index: 1, kind: input, shape index: {}]   ;;  %s1331_s2 = inlined_call_operand.hbm [shape: f32[8,8,16], index: 2, kind: input, shape index: {}]   ;;  %s1332_s3 = inlined_call_operand.hbm [shape: f32[8,8,16], index: 3, kind: output, shape index: {}]  }
   0x1   :  { %1339 = sst [smem:[#allocation12_spill]] %s1329_s0 }
   0x2   :  { %8 = vsyncpa [#allocation3], 0 }
   0x3   :  { %10 = vsyncpa [#allocation3 + $0x1], 0 }
   0x4   :  { %11 = vsyncpa [#allocation6], 0 }
   0x5   :  { %13 = vsyncpa [#allocation6 + $0x1], 0 }
   0x6   :  { %14 = vsyncpa [#allocation4], 0 }
   0x7   :  { %16 = vsyncpa [#allocation4 + $0x1], 0  ;;  %s1054_s12 = smov 0   ;;  %s1056_s13 = smov 0  }
   0x8   :  { %s1058_s14 = smov 0   ;;  %s1060_s15 = smov 0  }
   0x9 LB: > { %s1075_s16 = sadd.s32 4294967295, %s1022_s15   ;;  %s732_s17 = sadd.s32 4294967294, %s1022_s15   ;;  %s1022_s15 = sphi %s1060_s15, %s1357_s15   ;;  %s1018_s14 = sphi %s1058_s14, %s1356_s14   ;;  %s1014_s13 = sphi %s1056_s13, %s1355_s13   ;;  %s1010_s12 = sphi %s1054_s12, %s1354_s12  }
   0xa   : > { %s1079_s18 = sadd.s32 1, %s1022_s15   ;;  %s29_s19 = sadd.s32 1, %s1018_s14 }
   0xb   : > { %s26_s20 = ssub.s32 %s1022_s15, %s1079_s18  ;;  %p36_p0 = scmp.ne.s32.totalorder %s1018_s14, %s1014_s13 }
   0xc   : > { %p27_p1 = scmp.eq.s32.totalorder %s26_s20, 0  ;;  %p37_p2 = scmp.eq.s32.totalorder %s1022_s15, 0 }
   0xd   : > { %p42_p3 = scmp.ne.s32.totalorder %s1014_s13, %s1010_s12  ;;  %p43_p4 = scmp.eq.s32.totalorder %s1075_s16, 0 }
   0xe   : > { %s1091_s21 = scalar_select %p27_p1, %s1018_s14, %s29_s19  }
   0xf   : > { %p38_p5 = por %p37_p2, %p36_p0  ;;  %p1093_p6 = por %p43_p4, %p42_p3 }
  0x10   : > { %p118_p7 = scmp.eq.s32.totalorder %s1075_s16, 3  ;;  %p124_p8 = scmp.eq.s32.totalorder %s732_s17, 3 }
  0x11   : > { %s1340_s22 = scalar_select %p1093_p6, 1, 0 }
  0x12   : > { %p814_p9 = scmp.lt.s32.totalorder %s1022_s15, 4  ;;  %p1099_p10 = por %p118_p7, %p36_p0 }
  0x13   : > { %p1103_p11 = por %p124_p8, %p42_p3  ;;  %s144_s25 = sand.u32 1, %s1018_s14  }
  0x14   : > { %s1341_s23 = scalar_select %p1099_p10, 1, 0 }
  0x15   : > { %s1342_s24 = scalar_select %p1103_p11, 1, 0 }
  0x16   : > { %s1109_s26 = sshll.u32 %s1022_s15, 8  ;;  %s1113_s27 = sshll.u32 %s144_s25, 4 }
  0x17   : > { %p1115_p12 = pnand %p814_p9, %p38_p5  ;;  %s165_s29 = sand.u32 1, %s1022_s15  }
  0x18   : > { %s1124_s5 = scalar_lea.hbm %s1330_s1, %s1109_s26  ;;  %s169_s6 = scalar_lea.vmem [#allocation5], %s1113_s27 }
  0x19   : > { %s176_s7 = sshll.u32 %s169_s6, 4  ;;  %s1130_s8 = scalar_lea.sflag [#allocation6], %s165_s29  ;;  %s1127_s7 = int_to_ptr.vmem [resolvable:$true] %s176_s7 }
  0x1a   : > { %s862_s9 = scalar_lea.hbm %s1124_s5, 256  ;;  %p1136_p1 = pneg %p1115_p12 }
  0x1b   : > { %p863_p0 = scmp.ne.s32.totalorder %s1124_s5, %s862_s9  ;;  %s867_s19 = scalar_lea.hbm %s1330_s1, 1024 }
  0x1c   : > { %p868_p4 = scmp.lt.u32.totalorder %s1124_s5, %s1330_s1  ;;  %p869_p5 = scmp.lt.u32.totalorder %s867_s19, %s862_s9 }
  0x1d   : > { %p865_p2 = pnand %p1136_p1, %p863_p0  ;;  %p871_p8 = scmp.lt.u32.totalorder %s862_s9, %s1124_s5 }
  0x1e   : > { %p870_p7 = por %p869_p5, %p868_p4 }
  0x1f   : > { %p866_p3 = pneg %p865_p2 }
  0x20   : > { %p872_p9 = por %p871_p8, %p870_p7 }
  0x22   : > { %p873_p13 = pnand %p872_p9, %p866_p3 }
  0x24   : > { %876 = shalt.err (!%p873_p13)
}
  0x25   : > { %s877_s29 = scalar_lea.vmem %s1127_s7, 256  ;;  %s1024_s4 = smov [#allocation5]  }
  0x26   : > { %p878_p0 = scmp.ne.s32.totalorder %s1127_s7, %s877_s29  ;;  %s882_s6 = sshll.u32 %s1024_s4, 4  ;;  %s883_s6 = int_to_ptr.vmem [resolvable:$false] %s882_s6 }
  0x27   : > { %s884_s11 = scalar_lea.vmem %s883_s6, 512  ;;  %p885_p10 = scmp.lt.s32.totalorder %s1127_s7, %s883_s6 }
  0x28   : > { %p880_p2 = pnand %p878_p0, %p1136_p1  ;;  %p886_p6 = scmp.lt.s32.totalorder %s884_s11, %s877_s29 }
  0x2a   : > { %p881_p11 = pneg %p880_p2  ;;  %p887_p4 = por %p886_p6, %p885_p10 }
  0x2c   : > { %p888_p5 = pnand %p887_p4, %p881_p11 }
  0x2e   : > { %891 = shalt.err (!%p888_p5)
}
  0x2f   : > { %s1335_s9 = smov 128   ;;  %s1337_s17 = smov 8  }
  0x30   : > { %806 = dma.hbm_to_vmem [thread:$0]  (!%p1115_p12), %s1124_s5, 256, %s1127_s7, %s1130_s8, %s1335_s9, %s1335_s9, %s1337_s17  }
  0x31   : > { %p205_p6 = scmp.lt.s32.totalorder %s1022_s15, 5  ;;  %s1345_s0 = sld [smem:[#allocation12_spill]] }
  0x32   : > { %p1346_p10 = scmp.ge.s32.totalorder %s1022_s15, 1  ;;  %s148_s4 = scalar_lea.vmem [#allocation2], %s1113_s27 }
  0x33   : > { %s155_s6 = sshll.u32 %s148_s4, 4  ;;  %s1181_s5 = scalar_lea.sflag [#allocation3], %s144_s25  ;;  %s1177_s6 = int_to_ptr.vmem [resolvable:$true] %s155_s6 }
  0x34   : > { %p1172_p11 = pnand %p1346_p10, %p205_p6 }
  0x36   : > { %s1347_s29 = scalar_select %p1172_p11, 1, 0 }
  0x37   : > { %s1168_s30 = scalar_lea.hbm %s1345_s0, %s1109_s26  ;;  %s897_s20 = scalar_lea.hbm %s1345_s0, 1024 }
  0x38   : > { %s892_s7 = scalar_lea.hbm %s1168_s30, 256  ;;  %p898_p8 = scmp.lt.u32.totalorder %s1168_s30, %s1345_s0 }
  0x39   : > { %p893_p13 = scmp.ne.s32.totalorder %s1168_s30, %s892_s7  ;;  %p899_p9 = scmp.lt.u32.totalorder %s897_s20, %s892_s7 }
  0x3a   : > { %p901_p2 = scmp.lt.u32.totalorder %s892_s7, %s1168_s30 }
  0x3b   : > { %p895_p3 = pnand %p893_p13, %p1136_p1  ;;  %p900_p0 = por %p899_p9, %p898_p8 }
  0x3d   : > { %p896_p7 = pneg %p895_p3  ;;  %p902_p4 = por %p901_p2, %p900_p0 }
  0x3f   : > { %p903_p5 = pnand %p902_p4, %p896_p7 }
  0x41   : > { %906 = shalt.err (!%p903_p5)
}
  0x42   : > { %s907_s25 = scalar_lea.vmem %s1177_s6, 256  ;;  %s1027_s4 = smov [#allocation2]  }
  0x43   : > { %p908_p6 = scmp.ne.s32.totalorder %s1177_s6, %s907_s25  ;;  %s912_s11 = sshll.u32 %s1027_s4, 4  ;;  %s913_s11 = int_to_ptr.vmem [resolvable:$false] %s912_s11 }
  0x44   : > { %s914_s9 = scalar_lea.vmem %s913_s11, 512  ;;  %p915_p3 = scmp.lt.s32.totalorder %s1177_s6, %s913_s11 }
  0x45   : > { %p910_p10 = pnand %p908_p6, %p1136_p1  ;;  %p916_p11 = scmp.lt.s32.totalorder %s914_s9, %s907_s25 }
  0x47   : > { %p911_p13 = pneg %p910_p10  ;;  %p917_p8 = por %p916_p11, %p915_p3 }
  0x49   : > { %p918_p9 = pnand %p917_p8, %p911_p13 }
  0x4b   : > { %921 = shalt.err (!%p918_p9)
}
  0x4c   : > { %s1348_s17 = smov 8   ;;  %s1349_s7 = smov 128  }
  0x4d   : > { %803 = dma.hbm_to_vmem [thread:$0]  (!%p1115_p12), %s1168_s30, 256, %s1177_s6, %s1181_s5, %s1349_s7, %s1349_s7, %s1348_s17  }
  0x4e   : > { %s1212_s4 = scalar_lea.hbm %s1331_s2, %s1109_s26  ;;  %s190_s25 = scalar_lea.vmem [#allocation7], %s1113_s27 }
  0x4f   : > { %s197_s11 = sshll.u32 %s190_s25, 4  ;;  %s922_s9 = scalar_lea.hbm %s1212_s4, 256  ;;  %s1215_s11 = int_to_ptr.vmem [resolvable:$true] %s197_s11 }
  0x50   : > { %p923_p11 = scmp.ne.s32.totalorder %s1212_s4, %s922_s9  ;;  %s927_s6 = scalar_lea.hbm %s1331_s2, 1024 }
  0x51   : > { %p928_p2 = scmp.lt.u32.totalorder %s1212_s4, %s1331_s2  ;;  %p929_p4 = scmp.lt.u32.totalorder %s927_s6, %s922_s9 }
  0x52   : > { %p925_p7 = pnand %p923_p11, %p1136_p1  ;;  %p931_p6 = scmp.lt.u32.totalorder %s922_s9, %s1212_s4 }
  0x53   : > { %p930_p5 = por %p929_p4, %p928_p2 }
  0x54   : > { %p926_p0 = pneg %p925_p7 }
  0x55   : > { %p932_p10 = por %p931_p6, %p930_p5 }
  0x57   : > { %p933_p13 = pnand %p932_p10, %p926_p0 }
  0x59   : > { %936 = shalt.err (!%p933_p13)
}
  0x5a   : > { %s937_s27 = scalar_lea.vmem %s1215_s11, 256  ;;  %s1028_s0 = smov [#allocation7]  }
  0x5b   : > { %p938_p3 = scmp.ne.s32.totalorder %s1215_s11, %s937_s27  ;;  %s942_s19 = sshll.u32 %s1028_s0, 4  ;;  %s943_s19 = int_to_ptr.vmem [resolvable:$false] %s942_s19 }
  0x5c   : > { %s944_s20 = scalar_lea.vmem %s943_s19, 512  ;;  %p945_p11 = scmp.lt.s32.totalorder %s1215_s11, %s943_s19 }
  0x5d   : > { %p940_p8 = pnand %p938_p3, %p1136_p1  ;;  %p946_p7 = scmp.lt.s32.totalorder %s944_s20, %s937_s27 }
  0x5f   : > { %p941_p9 = pneg %p940_p8  ;;  %p947_p2 = por %p946_p7, %p945_p11 }
  0x61   : > { %p948_p4 = pnand %p947_p2, %p941_p9 }
  0x63   : > { %951 = shalt.err (!%p948_p4)
}
  0x64   : > { %809 = dma.hbm_to_vmem [thread:$0]  (!%p1115_p12), %s1212_s4, 256, %s1215_s11, %s1130_s8, %s1349_s7, %s1349_s7, %s1348_s17  }
  0x65   : > { %p1350_p1 = scmp.ne.s32.totalorder %s1347_s29, 0 }
  0x66   : > { %s1245_s10 = sand.u32 (!%p1350_p1), 1, %s1014_s13   ;;  %p1351_p0 = scmp.ne.s32.totalorder (!%p1350_p1), %s1340_s22, 0 }
  0x67   : > { %209 = sbr.rel (%p1350_p1) target bundleno = 879 (0x36f), region = 32  ;;  %s1248_s25 = sshll.u32 (!%p1350_p1), %s1245_s10, 4 }
  0x68   : > { %s212_s28 = scalar_lea.sflag (!%p1350_p1), [#allocation3], %s1245_s10  ;;  %s215_s9 = scalar_lea.vmem (!%p1350_p1), [#allocation2], %s1248_s25 }
  0x6e   : > { %997 = dma.done.wait (%p1351_p0), %s212_s28, 256  }
  0x6f   : > { %999 = vsyncadd (%p1351_p0), %s212_s28, 4294967040  ;;  %s220_s8 = sand.u32 1, %s1075_s16   ;;  %s224_s17 = scalar_lea.vmem [#allocation5], %s1248_s25 }
  0x70   : > { %s221_s29 = scalar_lea.sflag [#allocation6], %s220_s8 }
  0x71   : > { %1001 = dma.done.wait (%p1351_p0), %s221_s29, 512  }
  0x72   : > { %1003 = vsyncadd (%p1351_p0), %s221_s29, 4294966784  ;;  %v1029_v0 = vmov 0.0   ;;  %vm1030_vm0 = vmmov 0   ;;  %vm276_vm1 = vcmask 130048   ;;  %v272_v1 = vld [vmem:[%s224_s17] sm:$0xff]  ;;  %v273_v2 = vld [vmem:[%s224_s17 + $0x8] sm:$0xff] }
  0x73   : > { %772 = vmatprep.subr.mxu0 %v1029_v0  ;;  %774 = vmatprep.mubr.msk.f32.mxu0 %vm1030_vm0, %v1029_v0  ;;  %v270_v3 = vld [vmem:[%s215_s9] sm:$0xff]  ;;  %v271_v4 = vld [vmem:[%s215_s9 + $0x8] sm:$0xff]  ;;  %vm431_vm2 = vcmask 64512   ;;  %s233_s22 = scalar_lea.vmem [#allocation7], %s1248_s25  ;;  %s265_s7 = scalar_lea.vmem [#allocation8], %s1248_s25 }
  0x74   : > { %777 = vmatprep.subr.mxu1 %v1029_v0  ;;  %779 = vmatprep.mubr.msk.f32.mxu1 %vm1030_vm0, %v1029_v0  ;;  %v274_v23 = vld [vmem:[%s233_s22] sm:$0xff]  ;;  %v275_v24 = vld [vmem:[%s233_s22 + $0x8] sm:$0xff]  ;;  %s616_s4 = sshll.u32 %s265_s7, 4  ;;  %s763_s11 = sshll.u32 %s1075_s16, 8  ;;  %s1280_s4 = int_to_ptr.vmem [resolvable:$true] %s616_s4 }
  0x75   : > { %773 = vmatpush3.xpose.msk.msra.mxu0 %vm276_vm1, %v272_v1  ;;  %778 = vmatpush3.xpose.msk.msra.mxu1 %vm276_vm1, %v273_v2  ;;  %s1285_s5 = scalar_lea.hbm %s1332_s3, %s763_s11  ;;  %s603_s26 = scalar_lea.sflag [#allocation4], %s1245_s10 }
  0x76   : > { %782 = vmatprep.subr.mxu0 %v1029_v0  ;;  %787 = vmatprep.subr.mxu1 %v1029_v0  ;;  %s952_s16 = scalar_lea.vmem %s1280_s4, 256  ;;  %p1352_p5 = scmp.ne.s32.totalorder %s1341_s23, 0 }
  0x77   : > { %p953_p12 = scmp.ne.s32.totalorder %s1280_s4, %s952_s16  ;;  %s1031_s27 = smov [#allocation8]  }
  0x78   : > { %775 = vmatmul.mubr.msk.f32.vlgmr.msra.gmra.mrb[0].mxu0 %vm276_vm1, %v270_v3  ;;  %780 = vmatmul.mubr.msk.f32.vlgmr.msra.gmra.mrb[0].mxu1 %vm276_vm1, %v271_v4  ;;  %s956_s0 = sshll.u32 %s1031_s27, 4  ;;  %s957_s0 = int_to_ptr.vmem [resolvable:$false] %s956_s0 }
  0x79   : > { %784 = vmatprep.mubr.msk.f32.mxu0 %vm1030_vm0, %v1029_v0  ;;  %789 = vmatprep.mubr.msk.f32.mxu1 %vm1030_vm0, %v1029_v0  ;;  %p954_p6 = pnand %p953_p12, %p1352_p5  ;;  %s958_s19 = scalar_lea.vmem %s957_s0, 512 }
  0x7a   : > { %783 = vmatpush3.msra.mxu0 %v274_v23  ;;  %788 = vmatpush3.msra.mxu1 %v275_v24  ;;  %p959_p13 = scmp.lt.s32.totalorder %s1280_s4, %s957_s0  ;;  %p960_p3 = scmp.lt.s32.totalorder %s958_s19, %s952_s16 }
  0x7b   : > { %p955_p10 = pneg %p954_p6 }
  0x7c   : > { %p961_p8 = por %p960_p3, %p959_p13 }
  0x7e   : > { %p962_p9 = pnand %p961_p8, %p955_p10 }
 0x14b   : > { %v349_v5 = vpop.f32.mrb[0].mxu0  ;;  %v425_v6 = vpop.f32.mrb[0].mxu1 }
 0x14c   : > { %v429_v7 = vmul.f32 0.35355338, %v349_v5  ;;  %v776_v8 = vpop.f32.mrb[1].mxu0  ;;  %v430_v9 = vmul.f32 0.35355338, %v425_v6  ;;  %v781_v10 = vpop.f32.mrb[1].mxu1 }
 0x14e   : > { %v432_v11 = vsel %vm431_vm2, %v429_v7, -inf  ;;  %v435_v12 = vsel %vm431_vm2, %v430_v9, -inf }
 0x14f   : > { %433 = vmax.xlane.f32.xlu0 %v432_v11 }
 0x153   : > { %436 = vmax.xlane.f32.xlu0 %v435_v12 }
 0x1dc   : > { %v434_v13 = vpop.xlane.xlu0 %433 }
 0x1dd   : > { %v438_v14 = vsub.f32 %v429_v7, %v434_v13 }
 0x1df   : > { %v440_v15 = vmul.f32 1.442695, %v438_v14 }
 0x1e0   : > { %v437_v16 = vpop.xlane.xlu0 %436 }
 0x1e1   : > { %854 = vpow2.f32 %v440_v15  ;;  %v439_v17 = vsub.f32 %v430_v9, %v437_v16 }
 0x1e3   : > { %v442_v18 = vmul.f32 1.442695, %v439_v17 }
 0x1e5   : > { %856 = vpow2.f32 %v442_v18 }
 0x1eb   : > { %v855_v19 = vpop.eup %854 }
 0x1ec   : > { %v444_v20 = vsel %vm431_vm2, %v855_v19, 0.0 }
 0x1ed   : > { %445 = vadd.xlane.f32.xlu1 %v444_v20 }
 0x1ef   : > { %v857_v21 = vpop.eup %856 }
 0x1f0   : > { %v447_v22 = vsel %vm431_vm2, %v857_v21, 0.0 }
 0x1f1   : > { %448 = vadd.xlane.f32.xlu1 %v447_v22 }
 0x27a   : > { %v446_v25 = vpop.xlane.xlu1 %445 }
 0x27b   : > { %858 = vrcp.f32 %v446_v25 }
 0x27e   : > { %v449_v26 = vpop.xlane.xlu1 %448 }
 0x27f   : > { %860 = vrcp.f32 %v449_v26 }
 0x285   : > { %v859_v27 = vpop.eup %858 }
 0x286   : > { %v451_v28 = vmul.f32 %v859_v27, %v855_v19 }
 0x288   : > { %785 = vmatmul.mubr.msk.f32.vlgmr.msra.gmra.mrb[2].mxu0 %vm431_vm2, %v451_v28 }
 0x289   : > { %v861_v29 = vpop.eup %860 }
 0x28a   : > { %v453_v30 = vmul.f32 %v861_v29, %v857_v21 }
 0x28c   : > { %790 = vmatmul.mubr.msk.f32.vlgmr.msra.gmra.mrb[2].mxu1 %vm431_vm2, %v453_v30 }
 0x35b   : > { %v523_v31 = vpop.f32.mrb[2].mxu0 }
 0x35c   : > { %600 = vst.msk [vmem:[%s265_s7] sm:$0xff] %vm276_vm1, %v523_v31  ;;  %v786_v32 = vpop.f32.mrb[3].mxu0 }
 0x35f   : > { %v596_v33 = vpop.f32.mrb[2].mxu1 }
 0x360   : > { %601 = vst.msk [vmem:[%s265_s7 + $0x8] sm:$0xff] %vm276_vm1, %v596_v33  ;;  %v791_v34 = vpop.f32.mrb[3].mxu1 }
 0x361   : > { %965 = shalt.err (!%p962_p9)
}
 0x362   : > { %s966_s20 = scalar_lea.hbm %s1285_s5, 256  ;;  %s970_s9 = scalar_lea.hbm %s1332_s3, 1024 }
 0x363   : > { %p967_p11 = scmp.ne.s32.totalorder %s1285_s5, %s966_s20  ;;  %p971_p4 = scmp.lt.u32.totalorder %s1285_s5, %s1332_s3 }
 0x364   : > { %p972_p1 = scmp.lt.u32.totalorder %s970_s9, %s966_s20  ;;  %p974_p12 = scmp.lt.u32.totalorder %s966_s20, %s1285_s5 }
 0x365   : > { %p968_p7 = pnand %p967_p11, %p1352_p5 }
 0x366   : > { %p973_p0 = por %p972_p1, %p971_p4 }
 0x367   : > { %p969_p2 = pneg %p968_p7 }
 0x368   : > { %p975_p6 = por %p974_p12, %p973_p0 }
 0x36a   : > { %p976_p10 = pnand %p975_p6, %p969_p2 }
 0x36c   : > { %979 = shalt.err (!%p976_p10)
}
 0x36d   : > { %s1032_s17 = smov 128   ;;  %s1033_s22 = smov 8  }
 0x36e   : > { %798 = dma.vmem_to_hbm [thread:$0]  (%p1352_p5), %s1280_s4, 256, %s1285_s5, %s603_s26, %s1032_s17, %s1032_s17, %s1033_s22  }
 0x36f PF: > { %p815_p13 = scmp.ge.s32.totalorder %s1022_s15, 2  ;;  %s631_s7 = sand.u32 1, %s1010_s12  }
 0x370   : > { %p1353_p3 = scmp.ne.s32.totalorder %s1342_s24, 0  ;;  %s632_s11 = scalar_lea.sflag [#allocation4], %s631_s7 }
 0x372   : > { %p811_p8 = pnand %p815_p13, %p1353_p3 }
 0x374   : > { %1005 = dma.done.wait (!%p811_p8), %s632_s11, 256  }
 0x375   : > { %1007 = vsyncadd (!%p811_p8), %s632_s11, 4294967040  ;;  %p19_p9 = scmp.ge.s32.totalorder %s1079_s18, 6   ;;  %s1354_s12 = smov %s1014_s13 }
 0x376   : > { %s1355_s13 = smov %s1018_s14  ;;  %s1356_s14 = smov %s1091_s21 }
 0x377   : > { %s1357_s15 = smov %s1079_s18  ;;  %21 = sbr.rel (!%p19_p9) target bundleno = 9 (0x9), region = 101 }
 0x37e   :  { %637 = vsyncpa [#allocation3], 1 }
 0x37f   :  { %639 = vsyncpa [#allocation3 + $0x1], 1 }
 0x380   :  { %640 = vsyncpa [#allocation6], 1 }
 0x381   :  { %642 = vsyncpa [#allocation6 + $0x1], 1 }
 0x382   :  { %643 = vsyncpa [#allocation4], 1 }
 0x383   :  { %645 = vsyncpa [#allocation4 + $0x1], 1 }

</bundles_post_ra>
